<compile_context>
chip_gen: v5e
topology: v5e:2x2
jax: 0.10.0
libtpu: 0.0.40
codegen_flags: <defaults>
</compile_context>

<pallas_src>
import jax
import jax.numpy as jnp
from jax import lax
from jax.experimental import pallas as pl
from jax.experimental.pallas import tpu as pltpu


def _fused_kernel(a_ref, w_ref, out_ref):
    N = a_ref.shape[0]
    a = a_ref[...]            # (N, N)  = A
    w = w_ref[...]            # (N, N)  = W

    # Contract lhs dim 0 with rhs dim 1 -> transposed results with no .T:
    dn = (((0,), (1,)), ((), ()))
    # m1t[j, i] = sum_m W[m, j] * A[i, m] = (A @ W)[i, j]       (= M1^T)
    m1t = lax.dot_general(w, a, dn, preferred_element_type=jnp.float32)
    # m2[j, k]  = sum_m A[m, j] * A[k, m] = (A^T @ A^T)[j, k]   (= M2)
    m2 = lax.dot_general(a, a, dn, preferred_element_type=jnp.float32)

    # out2d[j, i*N + k] = M1^T[j, i] + M2[j, k]; written as N lane-slabs with
    # static offsets into the lane-dense (N, N*N) output block.
    for i in range(N):
        out_ref[:, i * N:(i + 1) * N] = (m1t[:, i:i + 1] + m2).astype(out_ref.dtype)


def model_forward(x1, w_emb):
    """x1: (1, N, N) float32, w_emb: (N, N) float32 -> (N, N, 1, N) float32."""
    B, N, N2 = x1.shape
    assert B == 1 and N == N2 == w_emb.shape[0] == w_emb.shape[1]
    a = x1[0]

    out2d = pl.pallas_call(
        _fused_kernel,
        out_shape=jax.ShapeDtypeStruct((N, N * N), jnp.float32),
        in_specs=[
            pl.BlockSpec(memory_space=pltpu.MemorySpace.VMEM),   # A, whole array
            pl.BlockSpec(memory_space=pltpu.MemorySpace.VMEM),   # W, whole array
        ],
        out_specs=pl.BlockSpec(memory_space=pltpu.MemorySpace.VMEM),
    )(a, w_emb)

    # (N, N*N) -> (N, N, 1, N): row-major, metadata-only reshape in the wrapper.
    return out2d.reshape(N, N, 1, N)


def _reference(x1, w_emb):
    a = x1[0]
    m1 = a @ w_emb
    m2 = a.T @ a.T
    out = m1.T[:, :, None] + m2[:, None, :]          # out[j, i, k]
    return out.reshape(out.shape[0], out.shape[1], 1, out.shape[2])


if __name__ == "__main__":
    key = jax.random.PRNGKey(0)
    k_x, k_w = jax.random.split(key)
    N = 10  # nn.Embedding(10, 10) forces the feature dim to 10
    x1 = jax.random.normal(k_x, (1, N, N), dtype=jnp.float32)
    # Embedding weight init ~ N(0, 1), deterministic
    w_emb = jax.random.normal(k_w, (N, N), dtype=jnp.float32)

    out = model_forward(x1, w_emb)
    jax.block_until_ready(out)

    ref = _reference(x1, w_emb)
    assert out.shape == (N, N, 1, N), out.shape
    assert jnp.allclose(out, ref, atol=1e-5, rtol=1e-5), "mismatch vs reference"

    print("KERNEL_OK")
</pallas_src>

<mosaic_0001>
module attributes {stable_mosaic.version = 11 : i64} {
  func.func @_fused_kernel(%arg0: memref<10x10xf32, #tpu.memory_space<vmem>>, %arg1: memref<10x10xf32, #tpu.memory_space<vmem>>, %arg2: memref<10x100xf32, #tpu.memory_space<vmem>>) attributes {dimension_semantics = [], scalar_prefetch = 0 : i64, scratch_operands = 0 : i64, tpu.core_type = #tpu.core_type<tc>} {
    %c0 = arith.constant 0 : index
    %c0_0 = arith.constant 0 : index
    %0 = vector.load %arg0[%c0, %c0_0] : memref<10x10xf32, #tpu.memory_space<vmem>>, vector<10x10xf32>
    %c0_1 = arith.constant 0 : index
    %c0_2 = arith.constant 0 : index
    %1 = vector.load %arg1[%c0_1, %c0_2] : memref<10x10xf32, #tpu.memory_space<vmem>>, vector<10x10xf32>
    %cst = arith.constant dense<0.000000e+00> : vector<10x10xf32>
    %2 = tpu.matmul %1, %0, %cst {dimension_numbers = #tpu.dot_dimension_numbers<[0], [1], [1], [0], [0, 1, 1, 0], [], []>} : vector<10x10xf32>, vector<10x10xf32>, vector<10x10xf32> -> vector<10x10xf32>
    %cst_3 = arith.constant dense<0.000000e+00> : vector<10x10xf32>
    %3 = tpu.matmul %0, %0, %cst_3 {dimension_numbers = #tpu.dot_dimension_numbers<[0], [1], [1], [0], [0, 1, 1, 0], [], []>} : vector<10x10xf32>, vector<10x10xf32>, vector<10x10xf32> -> vector<10x10xf32>
    %4 = vector.extract_strided_slice %2 {offsets = [0, 0], sizes = [10, 1], strides = [1, 1]} : vector<10x10xf32> to vector<10x1xf32>
    %5 = vector.broadcast %4 : vector<10x1xf32> to vector<10x10xf32>
    %6 = arith.addf %5, %3 : vector<10x10xf32>
    %c0_4 = arith.constant 0 : index
    %c0_5 = arith.constant 0 : index
    %7 = vector.load %arg2[%c0_4, %c0_5] : memref<10x100xf32, #tpu.memory_space<vmem>>, vector<10x10xf32>
    tpu.vector_store %arg2[%c0_4, %c0_5], %6 {strides = array<i32>} : memref<10x100xf32, #tpu.memory_space<vmem>>, vector<10x10xf32>,
    %8 = vector.extract_strided_slice %2 {offsets = [0, 1], sizes = [10, 1], strides = [1, 1]} : vector<10x10xf32> to vector<10x1xf32>
    %9 = vector.broadcast %8 : vector<10x1xf32> to vector<10x10xf32>
    %10 = arith.addf %9, %3 : vector<10x10xf32>
    %c0_6 = arith.constant 0 : index
    %c10 = arith.constant 10 : index
    %11 = vector.load %arg2[%c0_6, %c10] : memref<10x100xf32, #tpu.memory_space<vmem>>, vector<10x10xf32>
    tpu.vector_store %arg2[%c0_6, %c10], %10 {strides = array<i32>} : memref<10x100xf32, #tpu.memory_space<vmem>>, vector<10x10xf32>,
    %12 = vector.extract_strided_slice %2 {offsets = [0, 2], sizes = [10, 1], strides = [1, 1]} : vector<10x10xf32> to vector<10x1xf32>
    %13 = vector.broadcast %12 : vector<10x1xf32> to vector<10x10xf32>
    %14 = arith.addf %13, %3 : vector<10x10xf32>
    %c0_7 = arith.constant 0 : index
    %c20 = arith.constant 20 : index
    %15 = vector.load %arg2[%c0_7, %c20] : memref<10x100xf32, #tpu.memory_space<vmem>>, vector<10x10xf32>
    tpu.vector_store %arg2[%c0_7, %c20], %14 {strides = array<i32>} : memref<10x100xf32, #tpu.memory_space<vmem>>, vector<10x10xf32>,
    %16 = vector.extract_strided_slice %2 {offsets = [0, 3], sizes = [10, 1], strides = [1, 1]} : vector<10x10xf32> to vector<10x1xf32>
    %17 = vector.broadcast %16 : vector<10x1xf32> to vector<10x10xf32>
    %18 = arith.addf %17, %3 : vector<10x10xf32>
    %c0_8 = arith.constant 0 : index
    %c30 = arith.constant 30 : index
    %19 = vector.load %arg2[%c0_8, %c30] : memref<10x100xf32, #tpu.memory_space<vmem>>, vector<10x10xf32>
    tpu.vector_store %arg2[%c0_8, %c30], %18 {strides = array<i32>} : memref<10x100xf32, #tpu.memory_space<vmem>>, vector<10x10xf32>,
    %20 = vector.extract_strided_slice %2 {offsets = [0, 4], sizes = [10, 1], strides = [1, 1]} : vector<10x10xf32> to vector<10x1xf32>
    %21 = vector.broadcast %20 : vector<10x1xf32> to vector<10x10xf32>
    %22 = arith.addf %21, %3 : vector<10x10xf32>
    %c0_9 = arith.constant 0 : index
    %c40 = arith.constant 40 : index
    %23 = vector.load %arg2[%c0_9, %c40] : memref<10x100xf32, #tpu.memory_space<vmem>>, vector<10x10xf32>
    tpu.vector_store %arg2[%c0_9, %c40], %22 {strides = array<i32>} : memref<10x100xf32, #tpu.memory_space<vmem>>, vector<10x10xf32>,
    %24 = vector.extract_strided_slice %2 {offsets = [0, 5], sizes = [10, 1], strides = [1, 1]} : vector<10x10xf32> to vector<10x1xf32>
    %25 = vector.broadcast %24 : vector<10x1xf32> to vector<10x10xf32>
    %26 = arith.addf %25, %3 : vector<10x10xf32>
    %c0_10 = arith.constant 0 : index
    %c50 = arith.constant 50 : index
    %27 = vector.load %arg2[%c0_10, %c50] : memref<10x100xf32, #tpu.memory_space<vmem>>, vector<10x10xf32>
    tpu.vector_store %arg2[%c0_10, %c50], %26 {strides = array<i32>} : memref<10x100xf32, #tpu.memory_space<vmem>>, vector<10x10xf32>,
    %28 = vector.extract_strided_slice %2 {offsets = [0, 6], sizes = [10, 1], strides = [1, 1]} : vector<10x10xf32> to vector<10x1xf32>
    %29 = vector.broadcast %28 : vector<10x1xf32> to vector<10x10xf32>
    %30 = arith.addf %29, %3 : vector<10x10xf32>
    %c0_11 = arith.constant 0 : index
    %c60 = arith.constant 60 : index
    %31 = vector.load %arg2[%c0_11, %c60] : memref<10x100xf32, #tpu.memory_space<vmem>>, vector<10x10xf32>
    tpu.vector_store %arg2[%c0_11, %c60], %30 {strides = array<i32>} : memref<10x100xf32, #tpu.memory_space<vmem>>, vector<10x10xf32>,
    %32 = vector.extract_strided_slice %2 {offsets = [0, 7], sizes = [10, 1], strides = [1, 1]} : vector<10x10xf32> to vector<10x1xf32>
    %33 = vector.broadcast %32 : vector<10x1xf32> to vector<10x10xf32>
    %34 = arith.addf %33, %3 : vector<10x10xf32>
    %c0_12 = arith.constant 0 : index
    %c70 = arith.constant 70 : index
    %35 = vector.load %arg2[%c0_12, %c70] : memref<10x100xf32, #tpu.memory_space<vmem>>, vector<10x10xf32>
    tpu.vector_store %arg2[%c0_12, %c70], %34 {strides = array<i32>} : memref<10x100xf32, #tpu.memory_space<vmem>>, vector<10x10xf32>,
    %36 = vector.extract_strided_slice %2 {offsets = [0, 8], sizes = [10, 1], strides = [1, 1]} : vector<10x10xf32> to vector<10x1xf32>
    %37 = vector.broadcast %36 : vector<10x1xf32> to vector<10x10xf32>
    %38 = arith.addf %37, %3 : vector<10x10xf32>
    %c0_13 = arith.constant 0 : index
    %c80 = arith.constant 80 : index
    %39 = vector.load %arg2[%c0_13, %c80] : memref<10x100xf32, #tpu.memory_space<vmem>>, vector<10x10xf32>
    tpu.vector_store %arg2[%c0_13, %c80], %38 {strides = array<i32>} : memref<10x100xf32, #tpu.memory_space<vmem>>, vector<10x10xf32>,
    %40 = vector.extract_strided_slice %2 {offsets = [0, 9], sizes = [10, 1], strides = [1, 1]} : vector<10x10xf32> to vector<10x1xf32>
    %41 = vector.broadcast %40 : vector<10x1xf32> to vector<10x10xf32>
    %42 = arith.addf %41, %3 : vector<10x10xf32>
    %c0_14 = arith.constant 0 : index
    %c90 = arith.constant 90 : index
    %43 = vector.load %arg2[%c0_14, %c90] : memref<10x100xf32, #tpu.memory_space<vmem>>, vector<10x10xf32>
    tpu.vector_store %arg2[%c0_14, %c90], %42 {strides = array<i32>} : memref<10x100xf32, #tpu.memory_space<vmem>>, vector<10x10xf32>,
    return
  }
}

</mosaic_0001>

<bundles_post_ra>
// kernel: tpu_custom_call.1
= control target key start
LH: loop header
LB: loop body
LE: loop exit
PB: predicated region body
PF: predicated region fallthrough
CT: control target
= control target key end

     0   :  { %7 = vsyncpa [#allocation3], 0  ;;  %s627_s0 = inlined_call_operand.hbm [shape: f32[10,10], index: 0, kind: input, shape index: {}]   ;;  %s628_s1 = inlined_call_operand.hbm [shape: f32[10,10], index: 1, kind: input, shape index: {}]   ;;  %s629_s2 = inlined_call_operand.hbm [shape: f32[10,100], index: 2, kind: output, shape index: {}]  }
   0x1   :  { %8 = vsyncpa [#allocation6], 0 }
   0x2   :  { %9 = vsyncpa [#allocation4], 0  ;;  %s14_s11 = sshll.u32 %s627_s0, 4  ;;  %s545_s12 = smov [#allocation2]   ;;  %s15_s11 = int_to_ptr.hbm [resolvable:$true] %s14_s11 }
   0x3   :  { %s16_s13 = sshll.u32 %s545_s12, 4  ;;  %s27_s16 = sshll.u32 %s628_s1, 4  ;;  %s17_s13 = int_to_ptr.vmem [resolvable:$true] %s16_s13  ;;  %s28_s16 = int_to_ptr.hbm [resolvable:$true] %s27_s16 }
   0x4   :  { %s546_s17 = smov 128   ;;  %s547_s18 = smov 8  }
   0x5   :  { %22 = dma.hbm_to_vmem [thread:$0]  %s15_s11, 256, %s17_s13, [#allocation3], %s546_s17, %s546_s17, %s547_s18  }
   0x6   :  { %s548_s19 = smov [#allocation5]  }
   0x7   :  { %s29_s20 = sshll.u32 %s548_s19, 4  ;;  %s30_s20 = int_to_ptr.vmem [resolvable:$true] %s29_s20 }
   0x8   :  { %35 = dma.hbm_to_vmem [thread:$0]  %s28_s16, 256, %s30_s20, [#allocation6], %s546_s17, %s546_s17, %s547_s18  }
   0x9   :  { %539 = dma.done.wait [#allocation3], 256  }
   0xa   :  { %540 = vsyncadd [#allocation3], 4294967040 }
   0xb   :  { %541 = dma.done.wait [#allocation6], 256  }
   0xc   :  { %542 = vsyncadd [#allocation6], 4294967040  ;;  %vm80_vm0 = vcmask 80896   ;;  %v46_v0 = vld [vmem:[#allocation5] sm:$0xff]  ;;  %v44_v1 = vld [vmem:[#allocation2] sm:$0xff]  ;;  %v549_v4 = vmov 0  }
   0xd   :  { %48 = vxpose.xlu0.b32.start [1/2] (short) (narrow) %v46_v0, 16  ;;  %116 = vxpose.xlu1.b32.start [1/2] (short) (narrow) %v44_v1, 16  ;;  %v45_v2 = vld [vmem:[#allocation2 + $0x8] sm:$0x3]  ;;  %v47_v3 = vld [vmem:[#allocation5 + $0x8] sm:$0x3] }
   0xe   :  { %410 = vmatpush.xpose.msk.msra.mxu0 %vm80_vm0, %v45_v2  ;;  %418 = vmatpush.xpose.msk.msra.mxu2 %vm80_vm0, %v45_v2  ;;  %v550_v5 = vmov 1   ;;  %v551_v6 = vmov 5   ;;  %v552_v12 = vmov 6   ;;  %v553_v13 = vmov 2   ;;  %s559_s0 = smov 10   ;;  %s560_s1 = smov 40  }
   0xf   :  { %414 = vmatpush.xpose.msk.msra.mxu1 %vm80_vm0, %v45_v2  ;;  %420 = vmatpush.xpose.msk.msra.mxu3 %vm80_vm0, %v45_v2  ;;  %v554_v15 = vmov 3   ;;  %v555_v16 = vmov 9   ;;  %v556_v17 = vmov 7   ;;  %v557_v18 = vmov 4   ;;  %s561_s21 = smov 20   ;;  %s562_s22 = smov 50  }
  0x10   :  { %447 = vset.pattern.permute.xlu2 %v549_v4  ;;  %v558_v19 = vmov 8   ;;  %s563_s23 = smov 30   ;;  %s564_s24 = smov 60   ;;  %vm190_vm1 = vcmask 74752   ;;  %vm210_vm2 = vcmask 162896   ;;  %vm232_vm3 = vcmask 244896  }
  0x11   :  { %s565_s25 = smov 80   ;;  %s566_s26 = smov 70   ;;  %vm254_vm4 = vcmask 326896   ;;  %vm276_vm5 = vcmask 408896   ;;  %vm212_vm6 = vcmask 156752   ;;  %vm298_vm7 = vcmask 490896  }
  0x12   :  { %411 = vmatpush.xpose.msk.msra.mxu0 %vm80_vm0, %v44_v1  ;;  %419 = vmatpush.xpose.msk.msra.mxu2 %vm80_vm0, %v44_v1  ;;  %s567_s27 = smov 90   ;;  %vm234_vm8 = vcmask 238752   ;;  %vm320_vm9 = vcmask 572896   ;;  %vm342_vm10 = vcmask 654896   ;;  %vm364_vm11 = vcmask 736896   ;;  %s568_s28 = smov [#allocation7]  }
  0x13   :  { %415 = vmatpush.xpose.msk.msra.mxu1 %vm80_vm0, %v44_v1  ;;  %421 = vmatpush.xpose.msk.msra.mxu3 %vm80_vm0, %v44_v1  ;;  %vm256_vm12 = vcmask 320752   ;;  %vm278_vm13 = vcmask 402752   ;;  %vm386_vm14 = vcmask 818896   ;;  %vm300_vm15 = vcmask 484752   ;;  %s394_s29 = sshll.u32 %s568_s28, 4  ;;  %s396_s4 = sshll.u32 %s629_s2, 4  ;;  %s395_s29 = int_to_ptr.vmem [resolvable:$true] %s394_s29  ;;  %s397_s4 = int_to_ptr.hbm [resolvable:$true] %s396_s4 }
  0x15   :  { %49 = vxpose.xlu0.b32.end [2/2] (short) (narrow) %v47_v3, 16  ;;  %117 = vxpose.xlu1.b32.end [2/2] (short) (narrow) %v45_v2, 16 }
  0x68   :  { %452 = vset.pattern.permute.xlu1 %v551_v6 }
  0x7c   :  { %448 = vset.pattern.permute.xlu0 %v550_v5 }
  0xb1   :  { %v64_v7 = vpop.trf.xlu0  ;;  %v132_v8 = vpop.trf.xlu1 }
  0xb2   :  { %412 = vmatmul.msk.f32.vlgmr.msra.gmra.mxu0 %vm80_vm0, %v64_v7  ;;  %416 = vmatmul.msk.f32.vlgmr.msra.gmra.mxu1 %vm80_vm0, %v132_v8 }
  0xb9   :  { %v65_v9 = vpop.trf.xlu0  ;;  %v133_v10 = vpop.trf.xlu1 }
  0xba   :  { %413 = vmatmul.msk.f32.vlgmr.msra.gmra.mxu2 %vm80_vm0, %v65_v9  ;;  %417 = vmatmul.msk.f32.vlgmr.msra.gmra.mxu3 %vm80_vm0, %v133_v10 }
 0x12f   :  { %v110_v11 = vpop.f32.mrf.mxu0  ;;  %v171_v20 = vpop.f32.mrf.mxu1 }
 0x130   :  { %281 = vperm.xlu1 %452, %v110_v11   ;;  %193 = vperm.xlu0 %448, %v110_v11  }
 0x131   :  { %179 = vperm.xlu2 %447, %v110_v11  }
 0x138   :  { %453 = vset.pattern.permute.xlu1 %v552_v12  ;;  %462 = vset.pattern.permute.xlu0 %v552_v12 }
 0x139   :  { %449 = vset.pattern.permute.xlu2 %v553_v13  ;;  %303 = vperm.xlu1 %453, %v110_v11  }
 0x13a   :  { %215 = vperm.xlu2 %449, %v110_v11  }
 0x13d   :  { %v113_v14 = vpop.f32.mrf.mxu2  ;;  %v174_v41 = vpop.f32.mrf.mxu3 }
 0x13e   :  { %307 = vperm.xlu0 %462, %v113_v14  }
 0x141   :  { %457 = vset.pattern.permute.xlu1 %v550_v5 }
 0x142   :  { %450 = vset.pattern.permute.xlu2 %v554_v15  ;;  %197 = vperm.xlu1 %457, %v113_v14  }
 0x143   :  { %237 = vperm.xlu2 %450, %v110_v11  }
 0x146   :  { %465 = vset.pattern.permute.xlu0 %v555_v16 }
 0x147   :  { %369 = vperm.xlu0 %465, %v110_v11  }
 0x14a   :  { %463 = vset.pattern.permute.xlu1 %v556_v17 }
 0x14b   :  { %451 = vset.pattern.permute.xlu2 %v557_v18  ;;  %329 = vperm.xlu1 %463, %v113_v14  }
 0x14c   :  { %259 = vperm.xlu2 %451, %v110_v11  }
 0x153   :  { %464 = vset.pattern.permute.xlu1 %v558_v19 }
 0x154   :  { %454 = vset.pattern.permute.xlu2 %v556_v17  ;;  %351 = vperm.xlu1 %464, %v113_v14  }
 0x155   :  { %325 = vperm.xlu2 %454, %v110_v11  }
 0x15d   :  { %455 = vset.pattern.permute.xlu2 %v558_v19 }
 0x15e   :  { %347 = vperm.xlu2 %455, %v110_v11  }
 0x166   :  { %456 = vset.pattern.permute.xlu2 %v549_v4 }
 0x167   :  { %184 = vperm.xlu2 %456, %v113_v14  }
 0x16f   :  { %458 = vset.pattern.permute.xlu2 %v553_v13 }
 0x170   :  { %219 = vperm.xlu2 %458, %v113_v14  }
 0x178   :  { %459 = vset.pattern.permute.xlu2 %v554_v15 }
 0x179   :  { %241 = vperm.xlu2 %459, %v113_v14  }
 0x181   :  { %460 = vset.pattern.permute.xlu2 %v557_v18 }
 0x182   :  { %263 = vperm.xlu2 %460, %v113_v14  }
 0x18a   :  { %461 = vset.pattern.permute.xlu2 %v551_v6 }
 0x18b   :  { %285 = vperm.xlu2 %461, %v113_v14   ;;  %v180_v21 = vpop.permute.xlu2 %179 }
 0x18c   :  { %v187_v22 = vadd.f32 %v180_v21, %v171_v20 }
 0x18e   :  { %189 = vst.msk [vmem:[#allocation7] sm:$0xff] %vm80_vm0, %v187_v22  ;;  %vm322_vm0 = vcmask 566752  }
 0x193   :  { %466 = vset.pattern.permute.xlu2 %v555_v16 }
 0x194   :  { %373 = vperm.xlu2 %466, %v113_v14   ;;  %v216_v23 = vpop.permute.xlu2 %215 }
 0x195   :  { %v222_v30 = vadd.f32 %v216_v23, %v171_v20 }
 0x19d   :  { %v238_v24 = vpop.permute.xlu2 %237 }
 0x19e   :  { %v244_v34 = vadd.f32 %v238_v24, %v171_v20 }
 0x1a2   :  { %v282_v25 = vpop.permute.xlu1 %281  ;;  %v194_v26 = vpop.permute.xlu0 %193 }
 0x1a3   :  { %v200_v27 = vadd.f32 %v194_v26, %v171_v20  ;;  %v288_v32 = vadd.f32 %v282_v25, %v171_v20 }
 0x1a5   :  { %204 = vrot.lane.b32.xlu2 %v200_v27, %s559_s0 }
 0x1a6   :  { %v260_v28 = vpop.permute.xlu2 %259 }
 0x1a7   :  { %v266_v29 = vadd.f32 %v260_v28, %v171_v20 }
 0x1a9   :  { %270 = vrot.lane.b32.xlu1 %v266_v29, %s560_s1 }
 0x1ab   :  { %v304_v31 = vpop.permute.xlu1 %303 }
 0x1ac   :  { %v310_v36 = vadd.f32 %v304_v31, %v171_v20 }
 0x1ad   :  { %226 = vrot.lane.b32.xlu2 %v222_v30, %s561_s21 }
 0x1af   :  { %v326_v33 = vpop.permute.xlu2 %325 }
 0x1b0   :  { %v308_v39 = vpop.permute.xlu0 %307  ;;  %v332_v40 = vadd.f32 %v326_v33, %v171_v20 }
 0x1b1   :  { %292 = vrot.lane.b32.xlu1 %v288_v32, %s562_s22  ;;  %v311_v44 = vadd.f32 %v308_v39, %v174_v41 }
 0x1b4   :  { %v198_v35 = vpop.permute.xlu1 %197 }
 0x1b5   :  { %248 = vrot.lane.b32.xlu2 %v244_v34, %s563_s23  ;;  %v201_v46 = vadd.f32 %v198_v35, %v174_v41 }
 0x1b8   :  { %v348_v37 = vpop.permute.xlu2 %347 }
 0x1b9   :  { %v354_v38 = vadd.f32 %v348_v37, %v171_v20  ;;  %314 = vrot.lane.b32.xlu1 %v310_v36, %s564_s24  ;;  %v370_v48 = vpop.permute.xlu0 %369 }
 0x1ba   :  { %v376_v49 = vadd.f32 %v370_v48, %v171_v20 }
 0x1bb   :  { %358 = vrot.lane.b32.xlu0 %v354_v38, %s565_s25 }
 0x1bd   :  { %v330_v42 = vpop.permute.xlu1 %329  ;;  %336 = vrot.lane.b32.xlu2 %v332_v40, %s566_s26 }
 0x1be   :  { %v333_v43 = vadd.f32 %v330_v42, %v174_v41 }
 0x1c1   :  { %338 = vrot.lane.b32.xlu1 %v333_v43, %s566_s26  ;;  %v185_v45 = vpop.permute.xlu2 %184 }
 0x1c2   :  { %v188_v47 = vadd.f32 %v185_v45, %v174_v41 }
 0x1c3   :  { %316 = vrot.lane.b32.xlu0 %v311_v44, %s564_s24 }
 0x1c4   :  { %191 = vst.msk [vmem:[#allocation7 + $0x8] sm:$0x3] %vm190_vm1, %v188_v47  ;;  %vm344_vm1 = vcmask 648752  }
 0x1c5   :  { %206 = vrot.lane.b32.xlu2 %v201_v46, %s559_s0 }
 0x1c6   :  { %v352_v58 = vpop.permute.xlu1 %351 }
 0x1c7   :  { %v355_v59 = vadd.f32 %v352_v58, %v174_v41 }
 0x1c9   :  { %380 = vrot.lane.b32.xlu1 %v376_v49, %s567_s27 }
 0x1ca   :  { %v220_v50 = vpop.permute.xlu2 %219 }
 0x1cb   :  { %v223_v51 = vadd.f32 %v220_v50, %v174_v41 }
 0x1cd   :  { %228 = vrot.lane.b32.xlu2 %v223_v51, %s561_s21 }
 0x1d3   :  { %v242_v52 = vpop.permute.xlu2 %241 }
 0x1d4   :  { %v245_v53 = vadd.f32 %v242_v52, %v174_v41 }
 0x1d6   :  { %250 = vrot.lane.b32.xlu2 %v245_v53, %s563_s23 }
 0x1dc   :  { %v264_v54 = vpop.permute.xlu2 %263 }
 0x1dd   :  { %v267_v55 = vadd.f32 %v264_v54, %v174_v41 }
 0x1df   :  { %272 = vrot.lane.b32.xlu2 %v267_v55, %s560_s1 }
 0x1e5   :  { %v286_v56 = vpop.permute.xlu2 %285 }
 0x1e6   :  { %v289_v57 = vadd.f32 %v286_v56, %v174_v41 }
 0x1e8   :  { %294 = vrot.lane.b32.xlu2 %v289_v57, %s562_s22 }
 0x1ee   :  { %v374_v60 = vpop.permute.xlu2 %373 }
 0x1ef   :  { %v377_v61 = vadd.f32 %v374_v60, %v174_v41 }
 0x1f0   :  { %360 = vrot.lane.b32.xlu2 %v355_v59, %s565_s25 }
 0x1f1   :  { %382 = vrot.lane.b32.xlu0 %v377_v61, %s567_s27 }
 0x1ff   :  { %v205_v62 = vpop.permute.xlu2 %204 }
 0x200   :  { %211 = vst.msk [vmem:[#allocation7] sm:$0xff] %vm210_vm2, %v205_v62  ;;  %vm366_vm2 = vcmask 730752  }
 0x207   :  { %v227_v63 = vpop.permute.xlu2 %226 }
 0x208   :  { %233 = vst.msk [vmem:[#allocation7] sm:$0xff] %vm232_vm3, %v227_v63  ;;  %vm388_vm3 = vcmask 812752  }
 0x20f   :  { %v249_v0 = vpop.permute.xlu2 %248 }
 0x210   :  { %255 = vst.msk [vmem:[#allocation7] sm:$0xff] %vm254_vm4, %v249_v0 }
 0x217   :  { %v337_v1 = vpop.permute.xlu2 %336 }
 0x21b   :  { %v271_v2 = vpop.permute.xlu1 %270 }
 0x21c   :  { %277 = vst.msk [vmem:[#allocation7] sm:$0xff] %vm276_vm5, %v271_v2 }
 0x21f   :  { %v207_v3 = vpop.permute.xlu2 %206 }
 0x220   :  { %213 = vst.msk [vmem:[#allocation7 + $0x8] sm:$0x3] %vm212_vm6, %v207_v3 }
 0x223   :  { %v293_v4 = vpop.permute.xlu1 %292 }
 0x224   :  { %299 = vst.msk [vmem:[#allocation7] sm:$0xff] %vm298_vm7, %v293_v4 }
 0x227   :  { %v229_v5 = vpop.permute.xlu2 %228 }
 0x228   :  { %235 = vst.msk [vmem:[#allocation7 + $0x8] sm:$0x3] %vm234_vm8, %v229_v5 }
 0x22b   :  { %v315_v6 = vpop.permute.xlu1 %314 }
 0x22c   :  { %321 = vst.msk [vmem:[#allocation7] sm:$0xff] %vm320_vm9, %v315_v6 }
 0x22d   :  { %v359_v7 = vpop.permute.xlu0 %358  ;;  %343 = vst.msk [vmem:[#allocation7] sm:$0xff] %vm342_vm10, %v337_v1 }
 0x22e   :  { %365 = vst.msk [vmem:[#allocation7] sm:$0xff] %vm364_vm11, %v359_v7 }
 0x230   :  { %v251_v8 = vpop.permute.xlu2 %250 }
 0x231   :  { %257 = vst.msk [vmem:[#allocation7 + $0x8] sm:$0x3] %vm256_vm12, %v251_v8 }
 0x233   :  { %v339_v9 = vpop.permute.xlu1 %338 }
 0x235   :  { %v317_v12 = vpop.permute.xlu0 %316 }
 0x239   :  { %v273_v10 = vpop.permute.xlu2 %272 }
 0x23a   :  { %279 = vst.msk [vmem:[#allocation7 + $0x8] sm:$0x3] %vm278_vm13, %v273_v10 }
 0x23b   :  { %v381_v11 = vpop.permute.xlu1 %380 }
 0x23c   :  { %387 = vst.msk [vmem:[#allocation7] sm:$0xff] %vm386_vm14, %v381_v11 }
 0x242   :  { %v295_v13 = vpop.permute.xlu2 %294 }
 0x243   :  { %301 = vst.msk [vmem:[#allocation7 + $0x8] sm:$0x3] %vm300_vm15, %v295_v13 }
 0x244   :  { %323 = vst.msk [vmem:[#allocation7 + $0x8] sm:$0x3] %vm322_vm0, %v317_v12 }
 0x245   :  { %345 = vst.msk [vmem:[#allocation7 + $0x8] sm:$0x3] %vm344_vm1, %v339_v9 }
 0x24a   :  { %v361_v14 = vpop.permute.xlu2 %360 }
 0x24b   :  { %367 = vst.msk [vmem:[#allocation7 + $0x8] sm:$0x3] %vm366_vm2, %v361_v14 }
 0x263   :  { %v383_v15 = vpop.permute.xlu0 %382 }
 0x264   :  { %389 = vst.msk [vmem:[#allocation7 + $0x8] sm:$0x3] %vm388_vm3, %v383_v15 }
 0x265   :  { %402 = dma.vmem_to_hbm [thread:$0]  %s395_s29, 256, %s397_s4, [#allocation4], %s546_s17, %s546_s17, %s547_s18  }
 0x266   :  { %543 = dma.done.wait [#allocation4], 256  }
 0x267   :  { %544 = vsyncadd [#allocation4], 4294967040 }
 0x268   :  { %407 = vsyncpa [#allocation3], 1 }
 0x269   :  { %408 = vsyncpa [#allocation6], 1 }
 0x26a   :  { %409 = vsyncpa [#allocation4], 1 }

</bundles_post_ra>
